<compile_context>
chip_gen: v7x
topology: tpu7x:2x2x1
jax: 0.10.0
libtpu: 0.0.40
codegen_flags: <defaults>
</compile_context>

<pallas_src>
import numpy as np
import jax
import jax.numpy as jnp
from jax import lax
from jax.experimental import pallas as pl
from jax.experimental.pallas import tpu as pltpu

_LOG_2PI = float(np.log(2.0 * np.pi))


# ---------------------------------------------------------------------------
# helpers
# ---------------------------------------------------------------------------
def _pad_to_multiple(x, axis, mult):
    n = x.shape[axis]
    pad = (-n) % mult
    if pad == 0:
        return x
    widths = [(0, 0)] * x.ndim
    widths[axis] = (0, pad)
    return jnp.pad(x, widths)


# ---------------------------------------------------------------------------
# Part 1: BernoulliDecoder (the spec module)
# ---------------------------------------------------------------------------
def _decoder_kernel(z_ref, w1_ref, b1_ref, w2_ref, b2_ref, logits_ref):
    z = z_ref[...].astype(jnp.float32)                                   # [TB, M]
    h = jnp.dot(z, w1_ref[...], preferred_element_type=jnp.float32)      # [TB, H]
    h = jnp.maximum(h + b1_ref[...], 0.0)                                # ReLU
    logits = jnp.dot(h, w2_ref[...], preferred_element_type=jnp.float32) # [TB, D]
    logits_ref[...] = (logits + b2_ref[...]).astype(logits_ref.dtype)


def bernoulli_decoder_logits(z, w1, b1, w2, b2, *, tile_b=512):
    """Fused decoder_net forward: z [B, M] -> Bernoulli logits [B, 28, 28]."""
    B, M = z.shape
    H = w1.shape[1]
    D = w2.shape[1]
    assert D == 28 * 28
    tb = min(tile_b, B)
    z_p = _pad_to_multiple(z, 0, tb)          # keep source dtype through the DMA
    Bp = z_p.shape[0]

    logits = pl.pallas_call(
        _decoder_kernel,
        out_shape=jax.ShapeDtypeStruct((Bp, D), jnp.float32),
        grid=(Bp // tb,),
        in_specs=[
            pl.BlockSpec((tb, M), lambda i: (i, 0)),   # z tile (pipelined)
            pl.BlockSpec((M, H), lambda i: (0, 0)),    # params: resident
            pl.BlockSpec((1, H), lambda i: (0, 0)),
            pl.BlockSpec((H, D), lambda i: (0, 0)),
            pl.BlockSpec((1, D), lambda i: (0, 0)),
        ],
        out_specs=pl.BlockSpec((tb, D), lambda i: (i, 0)),  # lane-dense output
        compiler_params=pltpu.CompilerParams(dimension_semantics=("parallel",)),
    )(z_p, w1.astype(jnp.float32), b1.reshape(1, H).astype(jnp.float32),
      w2.astype(jnp.float32), b2.reshape(1, D).astype(jnp.float32))

    return logits[:B].reshape(B, 28, 28)


class IndependentBernoulli:
    """Mirrors td.Independent(td.Bernoulli(logits=logits), 2)."""

    def __init__(self, logits):
        self.logits = logits                      # [B, 28, 28]

    @property
    def mean(self):
        return jax.nn.sigmoid(self.logits)

    def log_prob(self, x):
        # x*log(sigmoid(l)) + (1-x)*log(1-sigmoid(l)) = x*l - softplus(l)
        lp = x * self.logits - jax.nn.softplus(self.logits)
        return jnp.sum(lp, axis=(-2, -1))


def bernoulli_decoder_forward(z, w1, b1, w2, b2):
    """BernoulliDecoder.forward: returns the Independent-Bernoulli distribution."""
    return IndependentBernoulli(bernoulli_decoder_logits(z, w1, b1, w2, b2))


def _decoder_logits_ref(z, w1, b1, w2, b2):
    hp = jax.lax.Precision.HIGHEST
    h = jnp.maximum(jnp.dot(z, w1, precision=hp) + b1, 0.0)
    return (jnp.dot(h, w2, precision=hp) + b2).reshape(z.shape[0], 28, 28)


# ---------------------------------------------------------------------------
# Part 2: MoGPrior.log_prob (previous kernel, improved per the perf review)
# ---------------------------------------------------------------------------
def _mog_precompute(mean, std, weights):
    """Hoisted parameter-only math -> fused weight matrix + per-component bias."""
    mean = mean.astype(jnp.float32)
    std = std.astype(jnp.float32)
    w = weights.astype(jnp.float32)
    k, M = mean.shape

    var = std * std                           # Normal(mean, sqrt(std**2)) -> var
    inv_var = 1.0 / var
    # total[b,k] = -0.5*sum_m (z-mu)^2/var + bias_k
    #            = sum_m (-0.5*inv_var)*z^2 + (mu*inv_var)*z  + bias_k
    Wmat = jnp.concatenate([-0.5 * inv_var, mean * inv_var], axis=-1)   # [k, 2M]
    logw = jax.nn.log_softmax(w)                                        # [k]
    bias = (-0.5 * jnp.sum(mean * mean * inv_var, axis=-1)
            - 0.5 * jnp.sum(jnp.log(var), axis=-1)
            - 0.5 * M * _LOG_2PI
            + logw)                                                     # [k]

    k_pad = max(8, ((k + 7) // 8) * 8)                                  # k on sublanes
    Wmat = jnp.pad(Wmat, ((0, k_pad - k), (0, 0)))
    bias = jnp.pad(bias, (0, k_pad - k), constant_values=-1e30)         # dead components
    return Wmat, bias.reshape(k_pad, 1)


def _mog_logprob_kernel(zt_ref, w_ref, bias_ref, out_ref):
    zt = zt_ref[...].astype(jnp.float32)                    # [M, TB] (batch on lanes)
    z_aug = jnp.concatenate([zt * zt, zt], axis=0)          # [2M, TB]
    total = jnp.dot(w_ref[...], z_aug,
                    preferred_element_type=jnp.float32) + bias_ref[...]  # [k_pad, TB]
    # logsumexp over components = cheap sublane fold; result is lane-dense [1, TB].
    t_max = jnp.max(total, axis=0, keepdims=True)
    out = t_max + jnp.log(jnp.sum(jnp.exp(total - t_max), axis=0, keepdims=True))
    out_ref[...] = out.astype(out_ref.dtype)


def mog_prior_log_prob(z, mean, std, weights, *, tile_b=1024):
    """log_prob of the MixtureSameFamily prior at z: [B, M] -> [B]."""
    B, M = z.shape
    Wmat, bias = _mog_precompute(mean, std, weights)
    k_pad = Wmat.shape[0]

    zt = z.T                                    # layout plumbing: batch -> lane axis
    tb = min(tile_b, B)
    zt_p = _pad_to_multiple(zt, 1, tb)
    Bp = zt_p.shape[1]

    out = pl.pallas_call(
        _mog_logprob_kernel,
        out_shape=jax.ShapeDtypeStruct((1, Bp), jnp.float32),
        grid=(Bp // tb,),
        in_specs=[
            pl.BlockSpec((M, tb), lambda i: (0, i)),        # z tile (pipelined)
            pl.BlockSpec((k_pad, 2 * M), lambda i: (0, 0)), # fused params: resident
            pl.BlockSpec((k_pad, 1), lambda i: (0, 0)),
        ],
        out_specs=pl.BlockSpec((1, tb), lambda i: (0, i)),  # lane-dense output
        compiler_params=pltpu.CompilerParams(dimension_semantics=("parallel",)),
    )(zt_p, Wmat, bias)
    return out[0, :B]


def mog_prior_log_prob_ref(z, mean, std, weights):
    """Pure-JAX reference mirroring torch.distributions semantics."""
    scale = jnp.sqrt(std ** 2)
    logw = jax.nn.log_softmax(weights)
    diff = z[:, None, :] - mean[None, :, :]
    comp = -0.5 * (diff / scale[None]) ** 2 - jnp.log(scale[None]) - 0.5 * _LOG_2PI
    comp_lp = jnp.sum(comp, axis=-1)
    return jax.scipy.special.logsumexp(comp_lp + logw[None, :], axis=-1)


# ---------------------------------------------------------------------------
if __name__ == "__main__":
    key = jax.random.PRNGKey(0)
    kz, kw1, kb1, kw2, kb2, kx, km, ks, kzp = jax.random.split(key, 9)

    # ---- BernoulliDecoder (the spec) ----
    B, M, H, D = 8, 32, 128, 28 * 28
    z = jax.random.normal(kz, (B, M), dtype=jnp.float32)
    w1 = jax.random.normal(kw1, (M, H), dtype=jnp.float32) / jnp.sqrt(M)
    b1 = jax.random.normal(kb1, (H,), dtype=jnp.float32) * 0.1
    w2 = jax.random.normal(kw2, (H, D), dtype=jnp.float32) / jnp.sqrt(H)
    b2 = jax.random.normal(kb2, (D,), dtype=jnp.float32) * 0.1

    dist = bernoulli_decoder_forward(z, w1, b1, w2, b2)
    logits = jax.block_until_ready(dist.logits)

    logits_ref = jax.block_until_ready(_decoder_logits_ref(z, w1, b1, w2, b2))
    np.testing.assert_allclose(np.asarray(logits), np.asarray(logits_ref),
                               rtol=1e-3, atol=1e-3)

    x = jax.random.bernoulli(kx, 0.3, (B, 28, 28)).astype(jnp.float32)
    lp = jax.block_until_ready(dist.log_prob(x))
    lp_ref = jnp.sum(x * logits_ref - jax.nn.softplus(logits_ref), axis=(-2, -1))
    np.testing.assert_allclose(np.asarray(lp), np.asarray(lp_ref),
                               rtol=1e-3, atol=1e-3)

    # ---- MoGPrior.log_prob (previously reviewed kernel, improved) ----
    K = 10
    mean = jax.random.normal(km, (K, M), dtype=jnp.float32)
    std = jax.random.normal(ks, (K, M), dtype=jnp.float32)
    weights = jnp.ones((K,), dtype=jnp.float32)
    z_prior = jax.random.normal(kzp, (B, M), dtype=jnp.float32)

    mog_lp = jax.block_until_ready(mog_prior_log_prob(z_prior, mean, std, weights))
    mog_lp_ref = jax.block_until_ready(
        mog_prior_log_prob_ref(z_prior, mean, std, weights))
    np.testing.assert_allclose(np.asarray(mog_lp), np.asarray(mog_lp_ref),
                               rtol=1e-3, atol=1e-3)

    print("KERNEL_OK")
</pallas_src>

<mosaic_0001>
module attributes {stable_mosaic.version = 11 : i64} {
  func.func @_decoder_kernel(%arg0: i32, %arg1: memref<8x32xf32, #tpu.memory_space<vmem>>, %arg2: memref<32x128xf32, #tpu.memory_space<vmem>>, %arg3: memref<1x128xf32, #tpu.memory_space<vmem>>, %arg4: memref<128x784xf32, #tpu.memory_space<vmem>>, %arg5: memref<1x784xf32, #tpu.memory_space<vmem>>, %arg6: memref<8x784xf32, #tpu.memory_space<vmem>>) attributes {dimension_semantics = [#tpu.dimension_semantics<parallel>], iteration_bounds = array<i64: 1>, scalar_prefetch = 0 : i64, scratch_operands = 0 : i64, tpu.core_type = #tpu.core_type<tc>, window_params = [{transform_indices = @transform_0, window_bounds = array<i64: 8, 32>}, {pipeline_mode = #tpu.pipeline_mode<synchronous>, transform_indices = @transform_1, window_bounds = array<i64: 32, 128>}, {pipeline_mode = #tpu.pipeline_mode<synchronous>, transform_indices = @transform_2, window_bounds = array<i64: 1, 128>}, {pipeline_mode = #tpu.pipeline_mode<synchronous>, transform_indices = @transform_3, window_bounds = array<i64: 128, 784>}, {pipeline_mode = #tpu.pipeline_mode<synchronous>, transform_indices = @transform_4, window_bounds = array<i64: 1, 784>}, {transform_indices = @transform_5, window_bounds = array<i64: 8, 784>}]} {
    %c0 = arith.constant 0 : index
    %c0_0 = arith.constant 0 : index
    %0 = vector.load %arg1[%c0, %c0_0] : memref<8x32xf32, #tpu.memory_space<vmem>>, vector<8x32xf32>
    %c0_1 = arith.constant 0 : index
    %c0_2 = arith.constant 0 : index
    %1 = vector.load %arg2[%c0_1, %c0_2] : memref<32x128xf32, #tpu.memory_space<vmem>>, vector<32x128xf32>
    %cst = arith.constant dense<0.000000e+00> : vector<8x128xf32>
    %2 = tpu.matmul %0, %1, %cst {dimension_numbers = #tpu.dot_dimension_numbers<[1], [0], [0], [1], [0, 0, 1, 1], [], []>} : vector<8x32xf32>, vector<32x128xf32>, vector<8x128xf32> -> vector<8x128xf32>
    %c0_3 = arith.constant 0 : index
    %c0_4 = arith.constant 0 : index
    %3 = vector.load %arg3[%c0_3, %c0_4] : memref<1x128xf32, #tpu.memory_space<vmem>>, vector<1x128xf32>
    %4 = vector.broadcast %3 : vector<1x128xf32> to vector<8x128xf32>
    %5 = arith.addf %2, %4 : vector<8x128xf32>
    %cst_5 = arith.constant 0.000000e+00 : f32
    %6 = vector.broadcast %cst_5 : f32 to vector<8x128xf32>
    %7 = arith.maximumf %5, %6 : vector<8x128xf32>
    %c0_6 = arith.constant 0 : index
    %c0_7 = arith.constant 0 : index
    %8 = vector.load %arg4[%c0_6, %c0_7] : memref<128x784xf32, #tpu.memory_space<vmem>>, vector<128x784xf32>
    %cst_8 = arith.constant dense<0.000000e+00> : vector<8x784xf32>
    %9 = tpu.matmul %7, %8, %cst_8 {dimension_numbers = #tpu.dot_dimension_numbers<[1], [0], [0], [1], [0, 0, 1, 1], [], []>} : vector<8x128xf32>, vector<128x784xf32>, vector<8x784xf32> -> vector<8x784xf32>
    %c0_9 = arith.constant 0 : index
    %c0_10 = arith.constant 0 : index
    %10 = vector.load %arg5[%c0_9, %c0_10] : memref<1x784xf32, #tpu.memory_space<vmem>>, vector<1x784xf32>
    %11 = vector.broadcast %10 : vector<1x784xf32> to vector<8x784xf32>
    %12 = arith.addf %9, %11 : vector<8x784xf32>
    %c0_11 = arith.constant 0 : index
    %c0_12 = arith.constant 0 : index
    %13 = vector.load %arg6[%c0_11, %c0_12] : memref<8x784xf32, #tpu.memory_space<vmem>>, vector<8x784xf32>
    tpu.vector_store %arg6[%c0_11, %c0_12], %12 {strides = array<i32>} : memref<8x784xf32, #tpu.memory_space<vmem>>, vector<8x784xf32>,
    return
  }
  func.func @transform_0(%arg0: i32) -> (i32, i32) {
    %c0_i32 = arith.constant 0 : i32
    %c0_i32_0 = arith.constant 0 : i32
    return %arg0, %c0_i32 : i32, i32
  }
  func.func @transform_1(%arg0: i32) -> (i32, i32) {
    %c0_i32 = arith.constant 0 : i32
    %c0_i32_0 = arith.constant 0 : i32
    %c0_i32_1 = arith.constant 0 : i32
    return %c0_i32, %c0_i32_0 : i32, i32
  }
  func.func @transform_2(%arg0: i32) -> (i32, i32) {
    %c0_i32 = arith.constant 0 : i32
    %c0_i32_0 = arith.constant 0 : i32
    %c0_i32_1 = arith.constant 0 : i32
    return %c0_i32, %c0_i32_0 : i32, i32
  }
  func.func @transform_3(%arg0: i32) -> (i32, i32) {
    %c0_i32 = arith.constant 0 : i32
    %c0_i32_0 = arith.constant 0 : i32
    %c0_i32_1 = arith.constant 0 : i32
    return %c0_i32, %c0_i32_0 : i32, i32
  }
  func.func @transform_4(%arg0: i32) -> (i32, i32) {
    %c0_i32 = arith.constant 0 : i32
    %c0_i32_0 = arith.constant 0 : i32
    %c0_i32_1 = arith.constant 0 : i32
    return %c0_i32, %c0_i32_0 : i32, i32
  }
  func.func @transform_5(%arg0: i32) -> (i32, i32) {
    %c0_i32 = arith.constant 0 : i32
    %c0_i32_0 = arith.constant 0 : i32
    return %arg0, %c0_i32 : i32, i32
  }
}

</mosaic_0001>

<bundles_post_ra>
// kernel: tpu_custom_call.1
= control target key start
LH: loop header
LB: loop body
LE: loop exit
PB: predicated region body
PF: predicated region fallthrough
CT: control target
= control target key end

     0   :  { %v786_v3 = vmov 0.0|0.0   ;;  %vm787_vm0 = vmmov 0   ;;  %v788_v6 = vmov 0.0   ;;  %vm33_vm1 = vcmask 261120   ;;  %s1213_s0 = inlined_call_operand.vmem [shape: f32[8,32], index: 0, kind: input, shape index: {}]   ;;  %s1214_s1 = inlined_call_operand.vmem [shape: f32[32,128], index: 1, kind: input, shape index: {}]   ;;  %s1215_s2 = inlined_call_operand.vmem [shape: f32[1,128], index: 2, kind: input, shape index: {}]   ;;  %s1216_s3 = inlined_call_operand.vmem [shape: f32[128,784], index: 3, kind: input, shape index: {}]   ;;  %s1217_s4 = inlined_call_operand.vmem [shape: f32[1,784], index: 4, kind: input, shape index: {}]   ;;  %s1218_s5 = inlined_call_operand.hbm [shape: f32[8,784], index: 5, kind: output, shape index: {}]  }
   0x1   :  { %v22_v0 = vld [vmem:[%s1214_s1] sm:$0xff]  ;;  %v23_v1 = vld [vmem:[%s1214_s1 + $0x8] sm:$0xff]  ;;  %v24_v2 = vld [vmem:[%s1214_s1 + $0x10] sm:$0xff]  ;;  %632 = vmatprep.subr.bf16.mxu0 %v786_v3  ;;  %594 = vmatprep.mubr.msk.f32.mxu0 %vm787_vm0, %v788_v6 }
   0x2   :  { %v633_v4 = vpack.c.bf16 %v23_v1, %v22_v0  ;;  %v25_v5 = vld [vmem:[%s1214_s1 + $0x18] sm:$0xff]  ;;  %v109_v7 = vld [vmem:[%s1216_s3 + $0x8] sm:$0xff]  ;;  %v116_v8 = vld [vmem:[%s1216_s3 + $0x40] sm:$0xff]  ;;  %321 = vmatprep.mubr.f32.mxu1 %v788_v6 }
   0x3   :  { %v111_v9 = vld [vmem:[%s1216_s3 + $0x18] sm:$0xff]  ;;  %v118_v10 = vld [vmem:[%s1216_s3 + $0x50] sm:$0xff]  ;;  %v636_v11 = vpack.c.bf16 %v25_v5, %v24_v2  ;;  %v638_v12 = vpack.c.bf16 %v116_v8, %v109_v7  ;;  %v108_v13 = vld [vmem:[%s1216_s3] sm:$0xff] }
   0x4   :  { %634 = vmatpush3.bf16.msra.mxu0 %v633_v4  ;;  %v115_v14 = vld [vmem:[%s1216_s3 + $0x38] sm:$0xff]  ;;  %v110_v15 = vld [vmem:[%s1216_s3 + $0x10] sm:$0xff]  ;;  %v670_v16 = vpack.c.bf16 %v118_v10, %v111_v9  ;;  %v117_v18 = vld [vmem:[%s1216_s3 + $0x48] sm:$0xff] }
   0x5   :  { %635 = vmatprep.subr.bf16.mxu0 %v786_v3  ;;  %v640_v17 = vpack.c.bf16 %v115_v14, %v108_v13  ;;  %v123_v19 = vld [vmem:[%s1216_s3 + $0x78] sm:$0xff]  ;;  %v130_v20 = vld [vmem:[%s1216_s3 + $0xb0] sm:$0xff]  ;;  %639 = vmatprep.subr.bf16.mxu1 %v638_v12  ;;  %v125_v22 = vld [vmem:[%s1216_s3 + $0x88] sm:$0xff]  ;;  %v672_v27 = vpack.c.bf16 %v117_v18, %v110_v15 }
   0x6   :  { %v642_v21 = vpack.c.bf16 %v130_v20, %v123_v19  ;;  %v132_v23 = vld [vmem:[%s1216_s3 + $0xc0] sm:$0xff]  ;;  %v122_v24 = vld [vmem:[%s1216_s3 + $0x70] sm:$0xff]  ;;  %v129_v26 = vld [vmem:[%s1216_s3 + $0xa8] sm:$0xff] }
   0x7   :  { %v21_v25 = vld [vmem:[%s1213_s0] sm:$0xff]  ;;  %641 = vmatpush1.bf16.msra.mxu1 %v640_v17  ;;  %v644_v28 = vpack.c.bf16 %v129_v26, %v122_v24  ;;  %v137_v30 = vld [vmem:[%s1216_s3 + $0xe8] sm:$0xff]  ;;  %v674_v32 = vpack.c.bf16 %v132_v23, %v125_v22  ;;  %v131_v33 = vld [vmem:[%s1216_s3 + $0xb8] sm:$0xff] }
   0x8   :  { %637 = vmatpush3.bf16.msra.mxu0 %v636_v11  ;;  %643 = vmatprep.subr.bf16.mxu1 %v642_v21  ;;  %v124_v29 = vld [vmem:[%s1216_s3 + $0x80] sm:$0xff]  ;;  %v143_v36 = vld [vmem:[%s1216_s3 + $0x118] sm:$0xff]  ;;  %v146_v38 = vld [vmem:[%s1216_s3 + $0x130] sm:$0xff] }
   0x9   :  { %v144_v31 = vld [vmem:[%s1216_s3 + $0x120] sm:$0xff]  ;;  %671 = vmatprep.subr.bf16.mxu0 %v670_v16  ;;  %v139_v37 = vld [vmem:[%s1216_s3 + $0xf8] sm:$0xff]  ;;  %v158_v41 = vld [vmem:[%s1216_s3 + $0x190] sm:$0xff]  ;;  %v676_v42 = vpack.c.bf16 %v131_v33, %v124_v29 }
   0xa   :  { %v646_v34 = vpack.c.bf16 %v144_v31, %v137_v30  ;;  %v136_v35 = vld [vmem:[%s1216_s3 + $0xe0] sm:$0xff]  ;;  %v151_v39 = vld [vmem:[%s1216_s3 + $0x158] sm:$0xff]  ;;  %v138_v43 = vld [vmem:[%s1216_s3 + $0xf0] sm:$0xff]  ;;  %v678_v47 = vpack.c.bf16 %v146_v38, %v139_v37 }
   0xb   :  { %595 = vmatmul.mubr.msk.f32.vlgmr.msra.gmra.mrb[0].mxu0 %vm33_vm1, %v21_v25  ;;  %645 = vmatpush1.bf16.msra.mxu1 %v644_v28  ;;  %v648_v40 = vpack.c.bf16 %v143_v36, %v136_v35  ;;  %v650_v44 = vpack.c.bf16 %v158_v41, %v151_v39  ;;  %v150_v45 = vld [vmem:[%s1216_s3 + $0x150] sm:$0xff]  ;;  %v157_v46 = vld [vmem:[%s1216_s3 + $0x188] sm:$0xff]  ;;  %v172_v50 = vld [vmem:[%s1216_s3 + $0x200] sm:$0xff] }
   0xc   :  { %673 = vmatpush1.bf16.msra.mxu0 %v672_v27  ;;  %647 = vmatprep.subr.bf16.mxu1 %v646_v34  ;;  %v145_v48 = vld [vmem:[%s1216_s3 + $0x128] sm:$0xff]  ;;  %v160_v52 = vld [vmem:[%s1216_s3 + $0x1a0] sm:$0xff]  ;;  %v652_v53 = vpack.c.bf16 %v157_v46, %v150_v45  ;;  %v171_v58 = vld [vmem:[%s1216_s3 + $0x1f8] sm:$0xff] }
   0xd   :  { %675 = vmatprep.subr.bf16.mxu0 %v674_v32  ;;  %v165_v49 = vld [vmem:[%s1216_s3 + $0x1c8] sm:$0xff]  ;;  %392 = vmatprep.mubr.f32.mxu0 %v788_v6  ;;  %v680_v54 = vpack.c.bf16 %v145_v48, %v138_v43  ;;  %v152_v55 = vld [vmem:[%s1216_s3 + $0x160] sm:$0xff]  ;;  %v159_v60 = vld [vmem:[%s1216_s3 + $0x198] sm:$0xff] }
   0xe   :  { %v153_v51 = vld [vmem:[%s1216_s3 + $0x168] sm:$0xff]  ;;  %v654_v56 = vpack.c.bf16 %v172_v50, %v165_v49  ;;  %v164_v57 = vld [vmem:[%s1216_s3 + $0x1c0] sm:$0xff]  ;;  %v179_v61 = vld [vmem:[%s1216_s3 + $0x238] sm:$0xff]  ;;  %v684_v4 = vpack.c.bf16 %v159_v60, %v152_v55 }
   0xf   :  { %649 = vmatpush1.bf16.msra.mxu1 %v648_v40  ;;  %v682_v59 = vpack.c.bf16 %v160_v52, %v153_v51  ;;  %v186_v62 = vld [vmem:[%s1216_s3 + $0x270] sm:$0xff]  ;;  %v167_v63 = vld [vmem:[%s1216_s3 + $0x1d8] sm:$0xff]  ;;  %v656_v1 = vpack.c.bf16 %v171_v58, %v164_v57  ;;  %v173_v5 = vld [vmem:[%s1216_s3 + $0x208] sm:$0xff] }
  0x10   :  { %677 = vmatpush1.bf16.msra.mxu0 %v676_v42  ;;  %651 = vmatprep.subr.bf16.mxu1 %v650_v44  ;;  %v174_v0 = vld [vmem:[%s1216_s3 + $0x210] sm:$0xff]  ;;  %v658_v7 = vpack.c.bf16 %v186_v62, %v179_v61  ;;  %v185_v9 = vld [vmem:[%s1216_s3 + $0x268] sm:$0xff]  ;;  %v200_v12 = vld [vmem:[%s1216_s3 + $0x2e0] sm:$0xff] }
  0x11   :  { %679 = vmatprep.subr.bf16.mxu0 %v678_v47  ;;  %v166_v2 = vld [vmem:[%s1216_s3 + $0x1d0] sm:$0xff]  ;;  %v686_v10 = vpack.c.bf16 %v174_v0, %v167_v63  ;;  %v193_v11 = vld [vmem:[%s1216_s3 + $0x2a8] sm:$0xff] }
  0x12   :  { %v178_v8 = vld [vmem:[%s1216_s3 + $0x230] sm:$0xff] }
  0x13   :  { %653 = vmatpush1.bf16.msra.mxu1 %v652_v53 }
  0x14   :  { %681 = vmatpush1.bf16.msra.mxu0 %v680_v54  ;;  %655 = vmatprep.subr.bf16.mxu1 %v654_v56 }
  0x15   :  { %683 = vmatprep.subr.bf16.mxu0 %v682_v59 }
  0x16   :  { %10 = vsyncpa [#allocation3], 0  ;;  %v181_v13 = vld [vmem:[%s1216_s3 + $0x248] sm:$0xff]  ;;  %v188_v14 = vld [vmem:[%s1216_s3 + $0x280] sm:$0xff]  ;;  %v660_v15 = vpack.c.bf16 %v185_v9, %v178_v8  ;;  %v688_v16 = vpack.c.bf16 %v173_v5, %v166_v2  ;;  %v662_v17 = vpack.c.bf16 %v200_v12, %v193_v11  ;;  %vm546_vm2 = vcmask 130048  }
  0x17   :  { %657 = vmatpush1.bf16.msra.mxu1 %v656_v1  ;;  %v192_v18 = vld [vmem:[%s1216_s3 + $0x2a0] sm:$0xff]  ;;  %v199_v19 = vld [vmem:[%s1216_s3 + $0x2d8] sm:$0xff]  ;;  %v690_v20 = vpack.c.bf16 %v188_v14, %v181_v13  ;;  %v202_v24 = vld [vmem:[%s1216_s3 + $0x2f0] sm:$0xff] }
  0x18   :  { %685 = vmatpush1.bf16.msra.mxu0 %v684_v4  ;;  %659 = vmatprep.subr.bf16.mxu1 %v658_v7  ;;  %v180_v21 = vld [vmem:[%s1216_s3 + $0x240] sm:$0xff]  ;;  %v187_v22 = vld [vmem:[%s1216_s3 + $0x278] sm:$0xff]  ;;  %v664_v25 = vpack.c.bf16 %v199_v19, %v192_v18  ;;  %v194_v28 = vld [vmem:[%s1216_s3 + $0x2b0] sm:$0xff] }
  0x19   :  { %687 = vmatprep.subr.bf16.mxu0 %v686_v10  ;;  %v195_v23 = vld [vmem:[%s1216_s3 + $0x2b8] sm:$0xff]  ;;  %v692_v26 = vpack.c.bf16 %v187_v22, %v180_v21  ;;  %v201_v29 = vld [vmem:[%s1216_s3 + $0x2e8] sm:$0xff]  ;;  %v214_v32 = vld [vmem:[%s1216_s3 + $0x350] sm:$0xff] }
  0x1a   :  { %v694_v27 = vpack.c.bf16 %v202_v24, %v195_v23  ;;  %v696_v30 = vpack.c.bf16 %v201_v29, %v194_v28  ;;  %v207_v31 = vld [vmem:[%s1216_s3 + $0x318] sm:$0xff]  ;;  %v209_v33 = vld [vmem:[%s1216_s3 + $0x328] sm:$0xff]  ;;  %v216_v35 = vld [vmem:[%s1216_s3 + $0x360] sm:$0xff] }
  0x1b   :  { %661 = vmatpush1.bf16.msra.mxu1 %v660_v15  ;;  %v666_v34 = vpack.c.bf16 %v214_v32, %v207_v31  ;;  %v206_v36 = vld [vmem:[%s1216_s3 + $0x310] sm:$0xff]  ;;  %v213_v37 = vld [vmem:[%s1216_s3 + $0x348] sm:$0xff]  ;;  %v698_v38 = vpack.c.bf16 %v216_v35, %v209_v33  ;;  %v208_v40 = vld [vmem:[%s1216_s3 + $0x320] sm:$0xff] }
  0x1c   :  { %689 = vmatpush1.bf16.msra.mxu0 %v688_v16  ;;  %663 = vmatprep.subr.bf16.mxu1 %v662_v17  ;;  %v668_v39 = vpack.c.bf16 %v213_v37, %v206_v36  ;;  %v215_v41 = vld [vmem:[%s1216_s3 + $0x358] sm:$0xff]  ;;  %v113_v43 = vld [vmem:[%s1216_s3 + $0x28] sm:$0xff]  ;;  %v120_v44 = vld [vmem:[%s1216_s3 + $0x60] sm:$0xff] }
  0x1d   :  { %691 = vmatprep.subr.bf16.mxu0 %v690_v20  ;;  %v700_v42 = vpack.c.bf16 %v215_v41, %v208_v40  ;;  %v702_v45 = vpack.c.bf16 %v120_v44, %v113_v43  ;;  %v562_v46 = vld [vmem:[%s1215_s2] ss:$0 sm:$0xff]  ;;  %v119_v48 = vld [vmem:[%s1216_s3 + $0x58] sm:$0xff]  ;;  %v114_v49 = vld [vmem:[%s1216_s3 + $0x30] sm:$0xff] }
  0x1e   :  { %v112_v47 = vld [vmem:[%s1216_s3 + $0x20] sm:$0xff]  ;;  %v121_v50 = vld [vmem:[%s1216_s3 + $0x68] sm:$0xff]  ;;  %v127_v52 = vld [vmem:[%s1216_s3 + $0x98] sm:$0xff] }
  0x1f   :  { %665 = vmatpush1.bf16.msra.mxu1 %v664_v25  ;;  %v134_v53 = vld [vmem:[%s1216_s3 + $0xd0] sm:$0xff]  ;;  %v704_v56 = vpack.c.bf16 %v119_v48, %v112_v47  ;;  %v735_v57 = vpack.c.bf16 %v121_v50, %v114_v49  ;;  %v133_v61 = vld [vmem:[%s1216_s3 + $0xc8] sm:$0xff]  ;;  %v128_v62 = vld [vmem:[%s1216_s3 + $0xa0] sm:$0xff] }
  0x20   :  { %693 = vmatpush1.bf16.msra.mxu0 %v692_v26  ;;  %667 = vmatprep.subr.bf16.mxu1 %v666_v34  ;;  %v126_v58 = vld [vmem:[%s1216_s3 + $0x90] sm:$0xff]  ;;  %v706_v60 = vpack.c.bf16 %v134_v53, %v127_v52  ;;  %v135_v63 = vld [vmem:[%s1216_s3 + $0xd8] sm:$0xff]  ;;  %v141_v0 = vld [vmem:[%s1216_s3 + $0x108] sm:$0xff] }
  0x21   :  { %695 = vmatprep.subr.bf16.mxu0 %v694_v27  ;;  %v148_v1 = vld [vmem:[%s1216_s3 + $0x140] sm:$0xff]  ;;  %v708_v2 = vpack.c.bf16 %v133_v61, %v126_v58  ;;  %v738_v4 = vpack.c.bf16 %v135_v63, %v128_v62  ;;  %v147_v8 = vld [vmem:[%s1216_s3 + $0x138] sm:$0xff]  ;;  %v142_v9 = vld [vmem:[%s1216_s3 + $0x110] sm:$0xff] }
  0x22   :  { %v140_v5 = vld [vmem:[%s1216_s3 + $0x100] sm:$0xff]  ;;  %v710_v7 = vpack.c.bf16 %v148_v1, %v141_v0  ;;  %v149_v10 = vld [vmem:[%s1216_s3 + $0x148] sm:$0xff]  ;;  %v155_v11 = vld [vmem:[%s1216_s3 + $0x178] sm:$0xff] }
  0x23   :  { %669 = vmatpush1.bf16.msra.mxu1 %v668_v39  ;;  %v162_v12 = vld [vmem:[%s1216_s3 + $0x1b0] sm:$0xff]  ;;  %v712_v13 = vpack.c.bf16 %v147_v8, %v140_v5  ;;  %v741_v14 = vpack.c.bf16 %v149_v10, %v142_v9  ;;  %v161_v17 = vld [vmem:[%s1216_s3 + $0x1a8] sm:$0xff]  ;;  %v163_v18 = vld [vmem:[%s1216_s3 + $0x1b8] sm:$0xff] }
  0x24   :  { %697 = vmatpush1.bf16.msra.mxu0 %v696_v30  ;;  %703 = vmatprep.subr.bf16.mxu1 %v702_v45  ;;  %v154_v15 = vld [vmem:[%s1216_s3 + $0x170] sm:$0xff]  ;;  %v714_v16 = vpack.c.bf16 %v162_v12, %v155_v11  ;;  %v169_v19 = vld [vmem:[%s1216_s3 + $0x1e8] sm:$0xff]  ;;  %v176_v20 = vld [vmem:[%s1216_s3 + $0x220] sm:$0xff] }
  0x25   :  { %699 = vmatprep.subr.bf16.mxu0 %v698_v38  ;;  %v716_v21 = vpack.c.bf16 %v161_v17, %v154_v15  ;;  %v168_v23 = vld [vmem:[%s1216_s3 + $0x1e0] sm:$0xff]  ;;  %v718_v24 = vpack.c.bf16 %v176_v20, %v169_v19  ;;  %v175_v25 = vld [vmem:[%s1216_s3 + $0x218] sm:$0xff]  ;;  %v170_v26 = vld [vmem:[%s1216_s3 + $0x1f0] sm:$0xff] }
  0x26   :  { %v177_v27 = vld [vmem:[%s1216_s3 + $0x228] sm:$0xff]  ;;  %v183_v28 = vld [vmem:[%s1216_s3 + $0x258] sm:$0xff]  ;;  %v190_v29 = vld [vmem:[%s1216_s3 + $0x290] sm:$0xff]  ;;  %v720_v30 = vpack.c.bf16 %v175_v25, %v168_v23 }
  0x27   :  { %v747_v31 = vpack.c.bf16 %v177_v27, %v170_v26  ;;  %v182_v32 = vld [vmem:[%s1216_s3 + $0x250] sm:$0xff]  ;;  %v722_v33 = vpack.c.bf16 %v190_v29, %v183_v28  ;;  %v189_v34 = vld [vmem:[%s1216_s3 + $0x288] sm:$0xff]  ;;  %v184_v35 = vld [vmem:[%s1216_s3 + $0x260] sm:$0xff] }
  0x28   :  { %701 = vmatpush1.bf16.msra.mxu0 %v700_v42  ;;  %v191_v36 = vld [vmem:[%s1216_s3 + $0x298] sm:$0xff]  ;;  %v197_v37 = vld [vmem:[%s1216_s3 + $0x2c8] sm:$0xff]  ;;  %v204_v38 = vld [vmem:[%s1216_s3 + $0x300] sm:$0xff]  ;;  %v724_v39 = vpack.c.bf16 %v189_v34, %v182_v32 }
  0x29   :  { %734 = vmatprep.subr.bf16.mxu0 %v786_v3  ;;  %v750_v40 = vpack.c.bf16 %v191_v36, %v184_v35  ;;  %v196_v41 = vld [vmem:[%s1216_s3 + $0x2c0] sm:$0xff]  ;;  %v726_v42 = vpack.c.bf16 %v204_v38, %v197_v37  ;;  %v203_v43 = vld [vmem:[%s1216_s3 + $0x2f8] sm:$0xff]  ;;  %v198_v44 = vld [vmem:[%s1216_s3 + $0x2d0] sm:$0xff] }
  0x2a   :  { %v205_v45 = vld [vmem:[%s1216_s3 + $0x308] sm:$0xff]  ;;  %v218_v47 = vld [vmem:[%s1216_s3 + $0x370] sm:$0xff]  ;;  %v728_v48 = vpack.c.bf16 %v203_v43, %v196_v41  ;;  %v212_v53 = vld [vmem:[%s1216_s3 + $0x340] sm:$0xff] }
  0x2b   :  { %v753_v49 = vpack.c.bf16 %v205_v45, %v198_v44  ;;  %v210_v50 = vld [vmem:[%s1216_s3 + $0x330] sm:$0xff]  ;;  %v217_v52 = vld [vmem:[%s1216_s3 + $0x368] sm:$0xff]  ;;  %v220_v62 = vld [vmem:[%s1217_s4] sm:$0x7f] }
  0xde   :  { %v103_v51 = vpop.f32.mrb[0].mxu0 }
  0xdf   :  { %v104_v54 = vadd.f32 %v562_v46, %v103_v51  ;;  %v596_v55 = vpop.f32.mrb[1].mxu0  ;;  %v211_v46 = vld [vmem:[%s1216_s3 + $0x338] sm:$0xff] }
  0xe0   :  { %v730_v51 = vpack.c.bf16 %v218_v47, %v211_v46  ;;  %v732_v55 = vpack.c.bf16 %v217_v52, %v210_v50 }
  0xe1   :  { %v1065_v59 = vmax.f32 %v104_v54, 0.0  ;;  %v219_v54 = vld [vmem:[%s1216_s3 + $0x378] sm:$0xff] }
  0xe3   :  { %322 = vmatmul.mubr.f32.vlgmr.msra.gmra.mrb[0].mxu1 %v1065_v59  ;;  %393 = vmatmul.mubr.f32.vlgmr.msra.gmra.mrb[2].mxu0 %v1065_v59 }
  0xe4   :  { %705 = vmatpush1.bf16.msra.mxu1 %v704_v56  ;;  %736 = vmatpush3.bf16.msra.mxu0 %v735_v57  ;;  %v756_v56 = vpack.c.bf16 %v219_v54, %v212_v53  ;;  %v222_v57 = vlaneseq }
  0xe5   :  { %707 = vmatprep.subr.bf16.mxu1 %v706_v60  ;;  %737 = vmatprep.subr.bf16.mxu0 %v786_v3 }
  0xe6   :  { %463 = vmatprep.mubr.f32.mxu1 %v788_v6  ;;  %629 = vmatprep.mubr.msk.f32.mxu0 %vm787_vm0, %v788_v6  ;;  %v156_v6 = vld [vmem:[%s1216_s3 + $0x180] sm:$0xff]  ;;  %v223_v58 = vshrl.u32 %v222_v57, 7  ;;  %s789_s3 = smov [#allocation2]  }
  0xe7   :  { %v744_v22 = vpack.c.bf16 %v163_v18, %v156_v6  ;;  %s554_s4 = sshll.u32 %s789_s3, 4  ;;  %s555_s4 = int_to_ptr.vmem [resolvable:$true] %s554_s4 }
  0xe8   :  { %709 = vmatpush1.bf16.msra.mxu1 %v708_v2  ;;  %739 = vmatpush3.bf16.msra.mxu0 %v738_v4  ;;  %v224_v60 = vsub.s32 0, %v223_v58  ;;  %v232_v61 = vsub.s32 2, %v223_v58  ;;  %v228_v63 = vsub.s32 1, %v223_v58  ;;  %v236_v0 = vsub.s32 3, %v223_v58  ;;  %s762_s2 = scalar_lea.vmem %s555_s4, 896  ;;  %p767_p1 = scmp.lt.s32.totalorder %s555_s4, %s555_s4 }
  0xe9   :  { %711 = vmatprep.subr.bf16.mxu1 %v710_v7  ;;  %740 = vmatprep.subr.bf16.mxu0 %v786_v3  ;;  %v244_v15 = vsub.s32 5, %v223_v58  ;;  %p763_p0 = scmp.ne.s32.totalorder %s555_s4, %s762_s2  ;;  %p768_p2 = scmp.lt.s32.totalorder %s762_s2, %s762_s2 }
  0xea   :  { %v225_v1 = vrot.slane %v220_v62, %v224_v60  ;;  %v233_v2 = vrot.slane %v220_v62, %v232_v61  ;;  %v229_v4 = vrot.slane %v220_v62, %v228_v63 }
  0xeb   :  { %v245_v6 = vrot.slane %v220_v62, %v244_v15  ;;  %p769_p3 = por %p768_p2, %p767_p1 }
  0xec   :  { %713 = vmatpush1.bf16.msra.mxu1 %v712_v13  ;;  %742 = vmatpush3.bf16.msra.mxu0 %v741_v14  ;;  %v240_v13 = vsub.s32 4, %v223_v58  ;;  %v248_v14 = vsub.s32 6, %v223_v58 }
  0xed   :  { %715 = vmatprep.subr.bf16.mxu1 %v714_v16  ;;  %743 = vmatprep.subr.bf16.mxu0 %v786_v3  ;;  %p770_p4 = pnand %p769_p3, %p763_p0 }
  0xee   :  { %v241_v16 = vrot.slane %v220_v62, %v240_v13  ;;  %v249_v17 = vrot.slane %v220_v62, %v248_v14 }
  0xf0   :  { %717 = vmatpush1.bf16.msra.mxu1 %v716_v21  ;;  %745 = vmatpush3.bf16.msra.mxu0 %v744_v22 }
  0xf1   :  { %719 = vmatprep.subr.bf16.mxu1 %v718_v24  ;;  %746 = vmatprep.subr.bf16.mxu0 %v786_v3 }
  0xf4   :  { %721 = vmatpush1.bf16.msra.mxu1 %v720_v30  ;;  %748 = vmatpush3.bf16.msra.mxu0 %v747_v31 }
  0xf5   :  { %723 = vmatprep.subr.bf16.mxu1 %v722_v33  ;;  %749 = vmatprep.subr.bf16.mxu0 %v786_v3 }
  0xf8   :  { %725 = vmatpush1.bf16.msra.mxu1 %v724_v39  ;;  %751 = vmatpush3.bf16.msra.mxu0 %v750_v40 }
  0xf9   :  { %727 = vmatprep.subr.bf16.mxu1 %v726_v42  ;;  %752 = vmatprep.subr.bf16.mxu0 %v786_v3 }
  0xfc   :  { %729 = vmatpush1.bf16.msra.mxu1 %v728_v48  ;;  %754 = vmatpush3.bf16.msra.mxu0 %v753_v49 }
  0xfd   :  { %731 = vmatprep.subr.bf16.mxu1 %v730_v51  ;;  %755 = vmatprep.subr.bf16.mxu0 %v786_v3  ;;  %v237_v3 = vrot.slane %v220_v62, %v236_v0 }
 0x100   :  { %733 = vmatpush1.bf16.msra.mxu1 %v732_v55  ;;  %757 = vmatpush3.bf16.msra.mxu0 %v756_v56 }
 0x103   :  { %464 = vmatmul.mubr.f32.vlgmr.msra.gmra.mrb[2].mxu1 %v1065_v59  ;;  %630 = vmatmul.mubr.f32.vlgmr.msra.gmra.mrb[4].mxu0 %v1065_v59 }
 0x1b6   :  { %v323_v5 = vpop.f32.mrb[0].mxu1  ;;  %v394_v7 = vpop.f32.mrb[2].mxu0 }
 0x1b7   :  { %v324_v8 = vadd.f32 %v323_v5, %v225_v1  ;;  %v395_v9 = vadd.f32 %v394_v7, %v233_v2  ;;  %v325_v10 = vpop.f32.mrb[1].mxu1  ;;  %v396_v59 = vpop.f32.mrb[3].mxu0 }
 0x1b8   :  { %v326_v11 = vadd.f32 %v325_v10, %v229_v4  ;;  %v397_v12 = vadd.f32 %v396_v59, %v237_v3 }
 0x1b9   :  { %540 = vst [vmem:[#allocation2] sm:$0xff] %v324_v8  ;;  %542 = vst [vmem:[#allocation2 + $0x10] sm:$0xff] %v395_v9 }
 0x1ba   :  { %541 = vst [vmem:[#allocation2 + $0x8] sm:$0xff] %v326_v11  ;;  %543 = vst [vmem:[#allocation2 + $0x18] sm:$0xff] %v397_v12 }
 0x1d6   :  { %v465_v18 = vpop.f32.mrb[2].mxu1  ;;  %v536_v19 = vpop.f32.mrb[4].mxu0 }
 0x1d7   :  { %v466_v20 = vadd.f32 %v465_v18, %v241_v16  ;;  %v537_v21 = vadd.f32 %v536_v19, %v249_v17  ;;  %v467_v22 = vpop.f32.mrb[3].mxu1  ;;  %v631_v23 = vpop.f32.mrb[5].mxu0 }
 0x1d8   :  { %v468_v24 = vadd.f32 %v467_v22, %v245_v6 }
 0x1d9   :  { %544 = vst [vmem:[#allocation2 + $0x20] sm:$0xff] %v466_v20  ;;  %547 = vst.msk [vmem:[#allocation2 + $0x30] sm:$0xff] %vm546_vm2, %v537_v21 }
 0x1da   :  { %545 = vst [vmem:[#allocation2 + $0x28] sm:$0xff] %v468_v24 }
 0x1db   :  { %773 = shalt.err (!%p770_p4)
}
 0x1dc   :  { %s774_s13 = scalar_lea.hbm %s1218_s5, 896 }
 0x1dd   :  { %p775_p5 = scmp.ne.s32.totalorder %s1218_s5, %s774_s13  ;;  %p778_p6 = scmp.lt.u32.totalorder %s774_s13, %s1218_s5 }
 0x1df   :  { %p780_p7 = pnand %p778_p6, %p775_p5 }
 0x1e1   :  { %783 = shalt.err (!%p780_p7)
}
 0x1e2   :  { %557 = dma.vmem_to_hbm [thread:$0]  %s555_s4, 896, %s1218_s5, [#allocation3]  }
 0x1e3   :  { %784 = dma.done.wait [#allocation3], 896  }
 0x1e4   :  { %785 = vsyncadd [#allocation3], 4294966400 }
 0x1e5   :  { %561 = vsyncpa [#allocation3], 1 }

</bundles_post_ra>
